<compile_context>
chip_gen: v7x
topology: tpu7x:2x2x1
jax: 0.10.0
libtpu: 0.0.40
codegen_flags: <defaults>
</compile_context>

<pallas_src>
import functools

import jax
import jax.numpy as jnp
from jax.experimental import pallas as pl
from jax.experimental.pallas import tpu as pltpu

LANES = 128
SUBLANES = 8

_DEFAULT_VMEM_BYTES = 128 * 1024 * 1024


def _chip_config():
    """Return (num_cores, vmem_capacity_bytes) for the current TPU."""
    vmem_bytes = _DEFAULT_VMEM_BYTES
    try:
        vmem_bytes = int(pltpu.get_tpu_info().vmem_capacity_bytes)
    except Exception:
        pass
    num_cores = 1
    try:
        kind = jax.devices()[0].device_kind.lower()
        # 2 TensorCores per device: v7x, and v4/v5p megacore.  v5e/v6e have 1.
        if ("7" in kind) or ("v4" in kind) or ("v5p" in kind):
            num_cores = 2
    except Exception:
        pass
    return num_cores, vmem_bytes


def _mse_kernel(x_ref, y_ref, o_ref, acc_ref, *,
                tile_rows, rows_valid, num_tiles, steps_per_core,
                last_tile_ragged, has_phantom):
    c = pl.program_id(0)                 # core-split axis ("parallel")
    i = pl.program_id(1)                 # reduction axis ("arbitrary")
    tile_idx = c * steps_per_core + i    # logical (unclamped) tile id

    @pl.when(i == 0)
    def _():
        acc_ref[...] = jnp.zeros_like(acc_ref)

    def accumulate(mask_rows):
        d = x_ref[...].astype(jnp.float32) - y_ref[...].astype(jnp.float32)
        if mask_rows:
            # Only the ragged boundary tile pays for the iota/compare/select.
            row_ids = tile_idx * tile_rows + jax.lax.broadcasted_iota(
                jnp.int32, (tile_rows, LANES), 0)
            d = jnp.where(row_ids < rows_valid, d, 0.0)
        sq = d * d
        # Pure VPU accumulation: fold the tile onto an (8, 128) vreg accumulator.
        acc_ref[...] += sq.reshape(tile_rows // SUBLANES, SUBLANES, LANES).sum(axis=0)

    if last_tile_ragged:
        # Interior tiles: unmasked.  Boundary tile: row-masked.  Phantom tiles
        # (clamped duplicates on the second core): skipped entirely.
        @pl.when(tile_idx < num_tiles - 1)
        def _():
            accumulate(mask_rows=False)

        @pl.when(tile_idx == num_tiles - 1)
        def _():
            accumulate(mask_rows=True)
    elif has_phantom:
        @pl.when(tile_idx < num_tiles)
        def _():
            accumulate(mask_rows=False)
    else:
        accumulate(mask_rows=False)

    @pl.when(i == pl.num_programs(1) - 1)
    def _():
        # Single cross-lane/sublane reduce per core, then the SMEM write.
        o_ref[0, 0] = jnp.sum(acc_ref[...])


def content_loss(x, target, *, target_step_bytes=8 << 20, max_tile_rows=None):
    """MSE loss between x and target (same shape); returns a float32 scalar."""
    assert x.shape == target.shape, "mse_loss requires matching shapes here"
    n = x.size
    assert n > 0

    xf = x.reshape(-1)
    yf = target.reshape(-1)

    rows = n // LANES
    n_aligned = rows * LANES

    # Tail (< 128 elements) handled with plain jnp -- avoids jnp.pad-ing full
    # HBM copies of BOTH inputs in the unaligned case.
    tail_sum = jnp.float32(0.0)
    if n_aligned != n:
        # TODO(synk): the aligned-prefix slice below may still materialize a copy
        # in XLA; a manual-DMA ragged tail inside the kernel would avoid it.
        xt = xf[n_aligned:].astype(jnp.float32)
        yt = yf[n_aligned:].astype(jnp.float32)
        tail_sum = jnp.sum((xt - yt) * (xt - yt))
        x2d = xf[:n_aligned].reshape(rows, LANES)
        y2d = yf[:n_aligned].reshape(rows, LANES)
    else:
        x2d = xf.reshape(rows, LANES)
        y2d = yf.reshape(rows, LANES)

    if rows == 0:  # tiny input, nothing aligned to stream
        return tail_sum * jnp.float32(1.0 / n)

    num_cores, vmem_capacity = _chip_config()

    # ---- byte-based tile sizing (dtype-aware), capped by per-chip VMEM ----
    row_bytes = LANES * (x.dtype.itemsize + target.dtype.itemsize)  # both inputs
    vmem_budget = vmem_capacity // 2                      # leave half as headroom
    tile_rows_vmem_cap = max(SUBLANES, vmem_budget // (2 * row_bytes))  # 2 buffers
    tile_rows_target = max(SUBLANES, target_step_bytes // row_bytes)
    rows_ceil8 = -(-rows // SUBLANES) * SUBLANES
    tile_rows = min(tile_rows_target, tile_rows_vmem_cap, rows_ceil8)
    if max_tile_rows is not None:
        tile_rows = min(tile_rows, max_tile_rows)
    tile_rows = max(SUBLANES, (tile_rows // SUBLANES) * SUBLANES)

    num_tiles = -(-rows // tile_rows)                     # cdiv
    if num_tiles < num_cores:
        num_cores = 1                                     # no useful 2-core split
    steps_per_core = -(-num_tiles // num_cores)           # cdiv
    last_tile_ragged = (num_tiles * tile_rows != rows)
    has_phantom = (steps_per_core * num_cores != num_tiles)

    def in_map(c, i):
        # Contiguous chunk of tiles per core; clamp keeps phantom tiles of the
        # second core in-bounds (their contribution is skipped in-kernel).
        return (jnp.minimum(c * steps_per_core + i, num_tiles - 1), 0)

    kernel = functools.partial(
        _mse_kernel,
        tile_rows=tile_rows,
        rows_valid=rows,
        num_tiles=num_tiles,
        steps_per_core=steps_per_core,
        last_tile_ragged=last_tile_ragged,
        has_phantom=has_phantom,
    )

    footprint = 2 * tile_rows * row_bytes                 # double-buffered inputs
    vmem_limit = int(min(vmem_capacity, max(16 << 20, footprint + (8 << 20))))

    partials = pl.pallas_call(
        kernel,
        out_shape=jax.ShapeDtypeStruct((num_cores, 1), jnp.float32),
        grid_spec=pltpu.PrefetchScalarGridSpec(
            num_scalar_prefetch=0,
            grid=(num_cores, steps_per_core),
            in_specs=[
                pl.BlockSpec((tile_rows, LANES), in_map),
                pl.BlockSpec((tile_rows, LANES), in_map),
            ],
            out_specs=pl.BlockSpec(
                (1, 1), lambda c, i: (c, 0), memory_space=pltpu.SMEM
            ),
            scratch_shapes=[pltpu.VMEM((SUBLANES, LANES), jnp.float32)],
        ),
        compiler_params=pltpu.CompilerParams(
            # TODO(synk): on v7x verify "parallel" actually shards the leading axis
            # across both TensorCores (xprof); if not, switch to pltpu.CORE_PARALLEL.
            dimension_semantics=("parallel", "arbitrary"),
            vmem_limit_bytes=vmem_limit,
        ),
        cost_estimate=pl.CostEstimate(
            flops=3 * n_aligned,
            transcendentals=0,
            bytes_accessed=n_aligned * (x.dtype.itemsize + target.dtype.itemsize),
        ),
    )(x2d, y2d)

    return (jnp.sum(partials) + tail_sum) * jnp.float32(1.0 / n)


def content_loss_ref(x, target):
    d = x.astype(jnp.float32) - target.astype(jnp.float32)
    return jnp.mean(d * d)


if __name__ == "__main__":
    key = jax.random.PRNGKey(0)
    k1, k2 = jax.random.split(key)
    # Small NCHW shapes consistent with an image-completion content loss.
    x = jax.random.normal(k1, (2, 4, 16, 16), dtype=jnp.float32)
    t = jax.random.normal(k2, (2, 4, 16, 16), dtype=jnp.float32)

    ref = content_loss_ref(x, t)

    loss = content_loss(x, t)
    jax.block_until_ready(loss)
    assert jnp.allclose(loss, ref, rtol=1e-5, atol=1e-6), (loss, ref)

    # Exercise the multi-tile accumulation path (and the core split where present).
    loss2 = content_loss(x, t, max_tile_rows=8)
    jax.block_until_ready(loss2)
    assert jnp.allclose(loss2, ref, rtol=1e-5, atol=1e-6), (loss2, ref)

    print("KERNEL_OK")
</pallas_src>

<mosaic_0001>
module attributes {stable_mosaic.version = 11 : i64} {
  func.func @_mse_kernel(%arg0: i32, %arg1: i32, %arg2: memref<16x128xf32, #tpu.memory_space<vmem>>, %arg3: memref<16x128xf32, #tpu.memory_space<vmem>>, %arg4: memref<1x1xf32, #tpu.memory_space<smem>>, %arg5: memref<8x128xf32, #tpu.memory_space<vmem>>) attributes {dimension_semantics = [#tpu.dimension_semantics<parallel>, #tpu.dimension_semantics<arbitrary>], iteration_bounds = array<i64: 1, 1>, scalar_prefetch = 0 : i64, scratch_operands = 1 : i64, tpu.core_type = #tpu.core_type<tc>, window_params = [{transform_indices = @transform_0, window_bounds = array<i64: 16, 128>}, {transform_indices = @transform_1, window_bounds = array<i64: 16, 128>}, {transform_indices = @transform_2, window_bounds = array<i64: 1, 1>}]} {
    %c0_i32 = arith.constant 0 : i32
    %0 = arith.cmpi eq, %arg1, %c0_i32 : i32
    %1 = arith.extui %0 : i1 to i32
    %c0_i32_0 = arith.constant 0 : i32
    %2 = arith.cmpi ne, %1, %c0_i32_0 : i32
    scf.if %2 {
      %cst_10 = arith.constant 0.000000e+00 : f32
      %15 = vector.broadcast %cst_10 : f32 to vector<8x128xf32>
      %c0_11 = arith.constant 0 : index
      %c0_12 = arith.constant 0 : index
      %16 = vector.load %arg5[%c0_11, %c0_12] : memref<8x128xf32, #tpu.memory_space<vmem>>, vector<8x128xf32>
      tpu.vector_store %arg5[%c0_11, %c0_12], %15 {strides = array<i32>} : memref<8x128xf32, #tpu.memory_space<vmem>>, vector<8x128xf32>,
    } else {
    }
    %c0 = arith.constant 0 : index
    %c0_1 = arith.constant 0 : index
    %3 = vector.load %arg2[%c0, %c0_1] : memref<16x128xf32, #tpu.memory_space<vmem>>, vector<16x128xf32>
    %c0_2 = arith.constant 0 : index
    %c0_3 = arith.constant 0 : index
    %4 = vector.load %arg3[%c0_2, %c0_3] : memref<16x128xf32, #tpu.memory_space<vmem>>, vector<16x128xf32>
    %5 = arith.subf %3, %4 : vector<16x128xf32>
    %6 = arith.mulf %5, %5 : vector<16x128xf32>
    %c0_4 = arith.constant 0 : index
    %c0_5 = arith.constant 0 : index
    %7 = vector.load %arg5[%c0_4, %c0_5] : memref<8x128xf32, #tpu.memory_space<vmem>>, vector<8x128xf32>
    %8 = vector.shape_cast %6 : vector<16x128xf32> to vector<2x8x128xf32>
    %cst = arith.constant dense<0.000000e+00> : vector<8x128xf32>
    %9 = vector.multi_reduction <add>, %8, %cst [0] : vector<2x8x128xf32> to vector<8x128xf32>
    %10 = arith.addf %7, %9 : vector<8x128xf32>
    %c0_6 = arith.constant 0 : index
    %c0_7 = arith.constant 0 : index
    %11 = vector.load %arg5[%c0_6, %c0_7] : memref<8x128xf32, #tpu.memory_space<vmem>>, vector<8x128xf32>
    tpu.vector_store %arg5[%c0_6, %c0_7], %10 {strides = array<i32>} : memref<8x128xf32, #tpu.memory_space<vmem>>, vector<8x128xf32>,
    %c0_i32_8 = arith.constant 0 : i32
    %12 = arith.cmpi eq, %arg1, %c0_i32_8 : i32
    %13 = arith.extui %12 : i1 to i32
    %c0_i32_9 = arith.constant 0 : i32
    %14 = arith.cmpi ne, %13, %c0_i32_9 : i32
    scf.if %14 {
      %c0_10 = arith.constant 0 : index
      %c0_11 = arith.constant 0 : index
      %15 = vector.load %arg5[%c0_10, %c0_11] : memref<8x128xf32, #tpu.memory_space<vmem>>, vector<8x128xf32>
      %16 = vector.shape_cast %15 : vector<8x128xf32> to vector<1x8x128xf32>
      %cst_12 = arith.constant dense<0.000000e+00> : vector<1xf32>
      %17 = vector.multi_reduction <add>, %16, %cst_12 [1, 2] : vector<1x8x128xf32> to vector<1xf32>
      %18 = vector.shape_cast %17 : vector<1xf32> to vector<1x1x1xf32>
      %19 = vector.extract %18[0, 0, 0] : f32 from vector<1x1x1xf32>
      %c0_13 = arith.constant 0 : index
      %c0_14 = arith.constant 0 : index
      %20 = memref.load %arg4[%c0_13, %c0_14] : memref<1x1xf32, #tpu.memory_space<smem>>
      memref.store %19, %arg4[%c0_13, %c0_14] : memref<1x1xf32, #tpu.memory_space<smem>>
    } else {
    }
    return
  }
  func.func @transform_0(%arg0: i32, %arg1: i32) -> (i32, i32) {
    %c1_i32 = arith.constant 1 : i32
    %0 = arith.muli %arg0, %c1_i32 : i32
    %1 = arith.addi %0, %arg1 : i32
    %c0_i32 = arith.constant 0 : i32
    %2 = arith.minsi %1, %c0_i32 : i32
    %c0_i32_0 = arith.constant 0 : i32
    %c0_i32_1 = arith.constant 0 : i32
    return %2, %c0_i32_0 : i32, i32
  }
  func.func @transform_1(%arg0: i32, %arg1: i32) -> (i32, i32) {
    %c1_i32 = arith.constant 1 : i32
    %0 = arith.muli %arg0, %c1_i32 : i32
    %1 = arith.addi %0, %arg1 : i32
    %c0_i32 = arith.constant 0 : i32
    %2 = arith.minsi %1, %c0_i32 : i32
    %c0_i32_0 = arith.constant 0 : i32
    %c0_i32_1 = arith.constant 0 : i32
    return %2, %c0_i32_0 : i32, i32
  }
  func.func @transform_2(%arg0: i32, %arg1: i32) -> (i32, i32) {
    %c0_i32 = arith.constant 0 : i32
    %c0_i32_0 = arith.constant 0 : i32
    return %arg0, %c0_i32 : i32, i32
  }
}

</mosaic_0001>

<bundles_post_ra>
// kernel: tpu_custom_call.1
= control target key start
LH: loop header
LB: loop body
LE: loop exit
PB: predicated region body
PF: predicated region fallthrough
CT: control target
= control target key end

     0   :  { %7 = vsyncpa [#allocation4], 0  ;;  %s234_s0 = inlined_call_operand.hbm [shape: f32[16,128], index: 0, kind: input, shape index: {}]   ;;  %s235_s1 = inlined_call_operand.hbm [shape: f32[16,128], index: 1, kind: input, shape index: {}]   ;;  %s236_s2 = inlined_call_operand.hbm [shape: f32[1,1], index: 2, kind: output, shape index: {}]  }
   0x1   :  { %8 = vsyncpa [#allocation7], 0 }
   0x2   :  { %9 = vsyncpa [#allocation5], 0  ;;  %s178_s9 = smov [#allocation3]   ;;  %s118_s13 = scalar_lea.hbm %s234_s0, 256 }
   0x3   :  { %s21_s10 = sshll.u32 %s178_s9, 4  ;;  %p119_p0 = scmp.ne.s32.totalorder %s234_s0, %s118_s13  ;;  %s22_s10 = int_to_ptr.vmem [resolvable:$true] %s21_s10 }
   0x4   :  { %p122_p1 = scmp.lt.u32.totalorder %s118_s13, %s234_s0 }
   0x6   :  { %p124_p2 = pnand %p122_p1, %p119_p0 }
   0x8   :  { %127 = shalt.err (!%p124_p2)
}
   0x9   :  { %s128_s18 = scalar_lea.vmem %s22_s10, 256  ;;  %p133_p4 = scmp.lt.s32.totalorder %s22_s10, %s22_s10 }
   0xa   :  { %p129_p3 = scmp.ne.s32.totalorder %s22_s10, %s128_s18  ;;  %p134_p5 = scmp.lt.s32.totalorder %s128_s18, %s128_s18 }
   0xc   :  { %p135_p6 = por %p134_p5, %p133_p4 }
   0xe   :  { %p136_p7 = pnand %p135_p6, %p129_p3 }
  0x10   :  { %139 = shalt.err (!%p136_p7)
}
  0x11   :  { %s179_s19 = smov 128   ;;  %s180_s20 = smov 8  }
  0x12   :  { %27 = dma.hbm_to_vmem [thread:$0]  %s234_s0, 256, %s22_s10, [#allocation4], %s179_s19, %s179_s19, %s180_s20  }
  0x13   :  { %s181_s23 = smov [#allocation6]   ;;  %s140_s27 = scalar_lea.hbm %s235_s1, 256 }
  0x14   :  { %s39_s24 = sshll.u32 %s181_s23, 4  ;;  %p141_p8 = scmp.ne.s32.totalorder %s235_s1, %s140_s27  ;;  %s40_s24 = int_to_ptr.vmem [resolvable:$true] %s39_s24 }
  0x15   :  { %p144_p9 = scmp.lt.u32.totalorder %s140_s27, %s235_s1 }
  0x17   :  { %p146_p10 = pnand %p144_p9, %p141_p8 }
  0x19   :  { %149 = shalt.err (!%p146_p10)
}
  0x1a   :  { %s150_s4 = scalar_lea.vmem %s40_s24, 256  ;;  %p155_p12 = scmp.lt.s32.totalorder %s40_s24, %s40_s24 }
  0x1b   :  { %p151_p11 = scmp.ne.s32.totalorder %s40_s24, %s150_s4  ;;  %p156_p13 = scmp.lt.s32.totalorder %s150_s4, %s150_s4 }
  0x1d   :  { %p157_p0 = por %p156_p13, %p155_p12 }
  0x1f   :  { %p158_p1 = pnand %p157_p0, %p151_p11 }
  0x21   :  { %161 = shalt.err (!%p158_p1)
}
  0x22   :  { %45 = dma.hbm_to_vmem [thread:$0]  %s235_s1, 256, %s40_s24, [#allocation7], %s179_s19, %s179_s19, %s180_s20  }
  0x23   :  { %172 = dma.done.wait [#allocation4], 256  }
  0x24   :  { %173 = vsyncadd [#allocation4], 4294967040 }
  0x25   :  { %174 = dma.done.wait [#allocation7], 256  }
  0x26   :  { %175 = vsyncadd [#allocation7], 4294967040  ;;  %v65_v0 = vld [vmem:[#allocation3] sm:$0xff]  ;;  %v66_v1 = vld [vmem:[#allocation3 + $0x8] sm:$0xff]  ;;  %s162_s8 = scalar_lea.hbm %s236_s2, 16 }
  0x27   :  { %v67_v2 = vld [vmem:[#allocation6] sm:$0xff]  ;;  %v68_v3 = vld [vmem:[#allocation6 + $0x8] sm:$0xff]  ;;  %p163_p2 = scmp.ne.s32.totalorder %s236_s2, %s162_s8  ;;  %p166_p3 = scmp.lt.u32.totalorder %s162_s8, %s236_s2 }
  0x28   :  { %v69_v4 = vsub.f32 %v65_v0, %v67_v2  ;;  %v70_v5 = vsub.f32 %v66_v1, %v68_v3 }
  0x29   :  { %p168_p4 = pnand %p166_p3, %p163_p2 }
  0x2a   :  { %v71_v6 = vmul.f32 %v69_v4, %v69_v4  ;;  %v72_v7 = vmul.f32 %v70_v5, %v70_v5 }
  0x2c   :  { %v74_v8 = vadd.f32 %v72_v7, %v71_v6 }
  0x2e   :  { %81 = vadd.xlane.f32.xlu0 %v74_v8 }
  0xbb   :  { %v82_v9 = vpop.xlane.xlu0 %81 }
  0xbc   :  { %v83_v10 = vrot.slane %v82_v9, 4 }
  0xbe   :  { %v84_v11 = vadd.f32 %v83_v10, %v82_v9 }
  0xc0   :  { %v85_v12 = vrot.slane %v84_v11, 2 }
  0xc2   :  { %v86_v13 = vadd.f32 %v85_v12, %v84_v11 }
  0xc4   :  { %v87_v14 = vrot.slane %v86_v13, 1 }
  0xc6   :  { %v88_v15 = vadd.f32 %v87_v14, %v86_v13 }
  0xc8   :  { %111 = vpush %v88_v15 }
  0xf9   :  { %s112_s1 = spop %111 }
  0xfa   :  { %91 = sst [smem:[#allocation8]] %s112_s1 }
  0xfb   :  { %171 = shalt.err (!%p168_p4)
}
  0xfc   :  { %s182_s13 = smov [#allocation8]  }
  0xfd   :  { %99 = dma.smem_to_hbm %s182_s13, 16, %s236_s2, [#allocation5]  }
  0xfe   :  { %176 = dma.done.wait [#allocation5], 16  }
  0xff   :  { %177 = vsyncadd [#allocation5], 4294967280 }
 0x100   :  { %103 = sfence }
 0x101   :  { %104 = vsyncpa [#allocation4], 1 }
 0x102   :  { %105 = vsyncpa [#allocation7], 1 }
 0x103   :  { %106 = vsyncpa [#allocation5], 1 }

</bundles_post_ra>
